<compile_context>
chip_gen: v7x
topology: tpu7x:2x2x1
jax: 0.10.0
libtpu: 0.0.40
codegen_flags: <defaults>
</compile_context>

<pallas_src>
import functools

import jax
import jax.numpy as jnp
from jax.experimental import pallas as pl
from jax.experimental.pallas import tpu as pltpu


def _round_up(n, m):
    return ((n + m - 1) // m) * m


def _vmem_budget_bytes():
    try:
        cap = pltpu.get_tpu_info().vmem_capacity_bytes
    except Exception:
        cap = 64 * 1024 * 1024        # conservative: v7x per-TensorCore VMEM
    # ~20% headroom for Mosaic internal scratch / semaphores:
    # v7x 64 MiB -> ~51 MiB, v5e/v6e 128 MiB -> ~102 MiB.
    return max(int(cap * 0.8), 32 * 1024 * 1024)


def _estimate_vmem(tm, tk, nk, D, x_isize, w_isize, o_isize):
    w_bufs = 1 if nk == 1 else 2                     # Buffered(1) when grid-invariant
    weights = w_bufs * (2 * D * tk + tk) * w_isize   # W1 block + W2 block + b1 block
    vectors = 3 * D * w_isize                        # b2, gamma, beta (single buffer)
    io = 2 * tm * D * (x_isize + o_isize)            # double-buffered x / out tiles
    acc = tm * D * 4                                 # f32 accumulator scratch
    hidden = tm * tk * 4                             # f32 ReLU activation
    epilogue = 4 * tm * D * 4                        # f32 residual/LN temporaries
    return weights + vectors + io + acc + hidden + epilogue


def _choose_tiling(M, D, F, x_isize, w_isize, o_isize, budget):
    """Pick (row tile tm, d_ff tile tk) that fits the VMEM budget.

    Prefers the largest tm (fewer grid steps, better epilogue amortization),
    tie-breaking toward the largest tk (weights resident -> no k streaming).
    """
    tk_candidates = [F] + [t for t in (4096, 2048, 1024, 512, 256, 128)
                           if t < F and F % t == 0]
    tm_candidates = [1024, 512, 256, 128, 64, 32, 16, 8]
    best = None
    for tk in tk_candidates:
        nk = F // tk
        for tm in tm_candidates:
            if _estimate_vmem(tm, tk, nk, D, x_isize, w_isize, o_isize) <= budget:
                if best is None or (tm, tk) > best:
                    best = (tm, tk)
                break
    if best is None:
        best = (8, tk_candidates[-1])
    tm, tk = best
    # Row-tile clamp: never exceed the row count, and keep >= 2 row blocks so
    # the "parallel" row axis can be sharded across v7x's two TensorCores.
    if M <= 8:
        tm = M
    elif tm >= M:
        tm = _round_up(pl.cdiv(M, 2), 8)
    return tm, tk


def _spec(shape, index_map, mode):
    if mode is None:
        return pl.BlockSpec(shape, index_map)
    return pl.BlockSpec(shape, index_map, pipeline_mode=mode)


def ffn_kernel(x_ref, w1_ref, b1_ref, w2_ref, b2_ref, g_ref, beta_ref,
               o_ref, acc_ref, *, single_k):
    x_in = x_ref[...]                                            # (tm, D) input dtype

    # Linear1 (this d_ff block): MXU in the weight dtype, f32 accumulation.
    h = jnp.dot(x_in.astype(w1_ref.dtype), w1_ref[...],
                preferred_element_type=jnp.float32)
    h = jnp.maximum(h + b1_ref[...].astype(jnp.float32), 0.0)   # (tm, tk) f32

    # Linear2 contribution of this d_ff block; keep the MXU on its fast path by
    # feeding it in the weight dtype, accumulate in f32.
    part = jnp.dot(h.astype(w2_ref.dtype), w2_ref[...],
                   preferred_element_type=jnp.float32)           # (tm, D) f32

    def epilogue(y):
        # bias2 + residual + LayerNorm, all in f32.
        z = x_in.astype(jnp.float32) + y + b2_ref[...].astype(jnp.float32)
        mean = jnp.mean(z, axis=-1, keepdims=True)
        cent = z - mean
        var = jnp.mean(cent * cent, axis=-1, keepdims=True)
        zn = cent * jax.lax.rsqrt(var + 1e-5)                    # nn.LayerNorm eps
        out = zn * g_ref[...].astype(jnp.float32) + beta_ref[...].astype(jnp.float32)
        o_ref[...] = out.astype(o_ref.dtype)

    if single_k:
        epilogue(part)
    else:
        k = pl.program_id(1)

        @pl.when(k == 0)
        def _():
            acc_ref[...] = jnp.zeros_like(acc_ref)

        acc_ref[...] += part

        @pl.when(k == pl.num_programs(1) - 1)
        def _():
            epilogue(acc_ref[...])


def simple_feed_forward(x, w1, b1, w2, b2, gamma, beta, *, tm=None, tk=None):
    """x: [batch, seq, d_model]; weights stored [in, out]; returns same shape/dtype."""
    B, S, D = x.shape
    F = w1.shape[1]
    M = B * S
    x2 = x.reshape(M, D)

    budget = _vmem_budget_bytes()
    auto_tm, auto_tk = _choose_tiling(M, D, F, x.dtype.itemsize,
                                      w1.dtype.itemsize, x.dtype.itemsize, budget)
    if tm is None:
        tm = auto_tm
    if tk is None:
        tk = auto_tk
    if F % tk != 0:
        raise ValueError(f"tk={tk} must evenly divide d_ff={F}")
    nk = F // tk
    single_k = nk == 1

    b1_2 = b1.reshape(1, F)
    b2_2 = b2.reshape(1, D)
    g2 = gamma.reshape(1, D)
    beta2 = beta.reshape(1, D)

    grid = (pl.cdiv(M, tm), nk)
    kernel = functools.partial(ffn_kernel, single_k=single_k)

    def build(once_mode):
        # `once_mode` goes on operands whose block never changes across the grid
        # (DMA'd exactly once); k-streamed operands keep default double-buffering
        # so their DMA overlaps the MXU work.
        w_mode = once_mode if single_k else None
        in_specs = [
            _spec((tm, D), lambda i, k: (i, 0), None),        # x row tile
            _spec((D, tk), lambda i, k: (0, k), w_mode),      # W1 column block
            _spec((1, tk), lambda i, k: (0, k), w_mode),      # b1 block
            _spec((tk, D), lambda i, k: (k, 0), w_mode),      # W2 row block
            _spec((1, D), lambda i, k: (0, 0), once_mode),    # b2
            _spec((1, D), lambda i, k: (0, 0), once_mode),    # LN gamma
            _spec((1, D), lambda i, k: (0, 0), once_mode),    # LN beta
        ]
        return pl.pallas_call(
            kernel,
            out_shape=jax.ShapeDtypeStruct((M, D), x.dtype),
            grid_spec=pltpu.PrefetchScalarGridSpec(
                num_scalar_prefetch=0,
                grid=grid,
                in_specs=in_specs,
                out_specs=pl.BlockSpec((tm, D), lambda i, k: (i, 0)),
                scratch_shapes=[pltpu.VMEM((tm, D), jnp.float32)],
            ),
            compiler_params=pltpu.CompilerParams(
                dimension_semantics=("parallel", "arbitrary"),
                vmem_limit_bytes=budget),
        )

    try:
        out2 = build(pl.Buffered(1))(x2, w1, b1_2, w2, b2_2, g2, beta2)
    except Exception:
        # TODO(synk): fallback for JAX builds that reject single-buffered
        # (pl.Buffered(1)) grid-invariant operands; costs one extra VMEM copy.
        out2 = build(None)(x2, w1, b1_2, w2, b2_2, g2, beta2)

    return out2.reshape(B, S, D)


def init_params(key, d_model, d_ff, dtype=jnp.float32):
    """Deterministic init mimicking nn.Linear's uniform(-1/sqrt(fan_in), ...)."""
    k1, k2, k3, k4 = jax.random.split(key, 4)
    lim1 = 1.0 / jnp.sqrt(d_model)
    lim2 = 1.0 / jnp.sqrt(d_ff)
    w1 = jax.random.uniform(k1, (d_model, d_ff), dtype, -lim1, lim1)
    b1 = jax.random.uniform(k2, (d_ff,), dtype, -lim1, lim1)
    w2 = jax.random.uniform(k3, (d_ff, d_model), dtype, -lim2, lim2)
    b2 = jax.random.uniform(k4, (d_model,), dtype, -lim2, lim2)
    gamma = jnp.ones((d_model,), dtype)   # nn.LayerNorm default
    beta = jnp.zeros((d_model,), dtype)
    return w1, b1, w2, b2, gamma, beta


def reference(x, w1, b1, w2, b2, gamma, beta):
    hp = jax.lax.Precision.HIGHEST
    h = jnp.maximum(jnp.dot(x, w1, precision=hp) + b1, 0.0)
    y = jnp.dot(h, w2, precision=hp) + b2
    z = x + y
    mean = jnp.mean(z, axis=-1, keepdims=True)
    var = jnp.mean((z - mean) ** 2, axis=-1, keepdims=True)
    return (z - mean) / jnp.sqrt(var + 1e-5) * gamma + beta


if __name__ == "__main__":
    key = jax.random.PRNGKey(0)
    kx, kp, kq = jax.random.split(key, 3)

    # Small TFT-like config: batch=2, seq=8, d_model=32, d_ff=64.
    batch, seq, d_model, d_ff = 2, 8, 32, 64
    x = jax.random.normal(kx, (batch, seq, d_model), jnp.float32)
    w1, b1, w2, b2, gamma, beta = init_params(kp, d_model, d_ff)

    out = jax.block_until_ready(simple_feed_forward(x, w1, b1, w2, b2, gamma, beta))
    ref = reference(x, w1, b1, w2, b2, gamma, beta)
    assert out.shape == x.shape and out.dtype == x.dtype
    assert jnp.allclose(out, ref, atol=1e-4, rtol=1e-4), "mismatch vs reference"

    # Ragged row count -> exercises the Pallas-masked partial last row block.
    x_odd = jax.random.normal(kx, (3, 7, d_model), jnp.float32)
    out_odd = jax.block_until_ready(
        simple_feed_forward(x_odd, w1, b1, w2, b2, gamma, beta))
    ref_odd = reference(x_odd, w1, b1, w2, b2, gamma, beta)
    assert jnp.allclose(out_odd, ref_odd, atol=1e-4, rtol=1e-4), "odd-shape mismatch"

    # Forced d_ff tiling -> exercises the streamed-weight accumulator (k) path.
    d_model2, d_ff2 = 128, 256
    x_k = jax.random.normal(kq, (batch, seq, d_model2), jnp.float32)
    p2 = init_params(kp, d_model2, d_ff2)
    out_k = jax.block_until_ready(simple_feed_forward(x_k, *p2, tk=128))
    ref_k = reference(x_k, *p2)
    assert jnp.allclose(out_k, ref_k, atol=2e-4, rtol=2e-4), "d_ff-tiled mismatch"

    print("KERNEL_OK")
</pallas_src>

<mosaic_0001>
module attributes {stable_mosaic.version = 11 : i64} {
  func.func @ffn_kernel(%arg0: i32, %arg1: i32, %arg2: memref<8x32xf32, #tpu.memory_space<vmem>>, %arg3: memref<32x64xf32, #tpu.memory_space<vmem>>, %arg4: memref<1x64xf32, #tpu.memory_space<vmem>>, %arg5: memref<64x32xf32, #tpu.memory_space<vmem>>, %arg6: memref<1x32xf32, #tpu.memory_space<vmem>>, %arg7: memref<1x32xf32, #tpu.memory_space<vmem>>, %arg8: memref<1x32xf32, #tpu.memory_space<vmem>>, %arg9: memref<8x32xf32, #tpu.memory_space<vmem>>, %arg10: memref<8x32xf32, #tpu.memory_space<vmem>>) attributes {dimension_semantics = [#tpu.dimension_semantics<parallel>, #tpu.dimension_semantics<arbitrary>], iteration_bounds = array<i64: 2, 1>, scalar_prefetch = 0 : i64, scratch_operands = 1 : i64, tpu.core_type = #tpu.core_type<tc>, window_params = [{transform_indices = @transform_0, window_bounds = array<i64: 8, 32>}, {pipeline_mode = #tpu.pipeline_mode<synchronous>, transform_indices = @transform_1, window_bounds = array<i64: 32, 64>}, {pipeline_mode = #tpu.pipeline_mode<synchronous>, transform_indices = @transform_2, window_bounds = array<i64: 1, 64>}, {pipeline_mode = #tpu.pipeline_mode<synchronous>, transform_indices = @transform_3, window_bounds = array<i64: 64, 32>}, {pipeline_mode = #tpu.pipeline_mode<synchronous>, transform_indices = @transform_4, window_bounds = array<i64: 1, 32>}, {pipeline_mode = #tpu.pipeline_mode<synchronous>, transform_indices = @transform_5, window_bounds = array<i64: 1, 32>}, {pipeline_mode = #tpu.pipeline_mode<synchronous>, transform_indices = @transform_6, window_bounds = array<i64: 1, 32>}, {transform_indices = @transform_7, window_bounds = array<i64: 8, 32>}]} {
    %c0 = arith.constant 0 : index
    %c0_0 = arith.constant 0 : index
    %0 = vector.load %arg2[%c0, %c0_0] : memref<8x32xf32, #tpu.memory_space<vmem>>, vector<8x32xf32>
    %c0_1 = arith.constant 0 : index
    %c0_2 = arith.constant 0 : index
    %1 = vector.load %arg3[%c0_1, %c0_2] : memref<32x64xf32, #tpu.memory_space<vmem>>, vector<32x64xf32>
    %cst = arith.constant dense<0.000000e+00> : vector<8x64xf32>
    %2 = tpu.matmul %0, %1, %cst {dimension_numbers = #tpu.dot_dimension_numbers<[1], [0], [0], [1], [0, 0, 1, 1], [], []>} : vector<8x32xf32>, vector<32x64xf32>, vector<8x64xf32> -> vector<8x64xf32>
    %c0_3 = arith.constant 0 : index
    %c0_4 = arith.constant 0 : index
    %3 = vector.load %arg4[%c0_3, %c0_4] : memref<1x64xf32, #tpu.memory_space<vmem>>, vector<1x64xf32>
    %4 = vector.broadcast %3 : vector<1x64xf32> to vector<8x64xf32>
    %5 = arith.addf %2, %4 : vector<8x64xf32>
    %cst_5 = arith.constant 0.000000e+00 : f32
    %6 = vector.broadcast %cst_5 : f32 to vector<8x64xf32>
    %7 = arith.maximumf %5, %6 : vector<8x64xf32>
    %c0_6 = arith.constant 0 : index
    %c0_7 = arith.constant 0 : index
    %8 = vector.load %arg5[%c0_6, %c0_7] : memref<64x32xf32, #tpu.memory_space<vmem>>, vector<64x32xf32>
    %cst_8 = arith.constant dense<0.000000e+00> : vector<8x32xf32>
    %9 = tpu.matmul %7, %8, %cst_8 {dimension_numbers = #tpu.dot_dimension_numbers<[1], [0], [0], [1], [0, 0, 1, 1], [], []>} : vector<8x64xf32>, vector<64x32xf32>, vector<8x32xf32> -> vector<8x32xf32>
    %10 = arith.addf %0, %9 : vector<8x32xf32>
    %c0_9 = arith.constant 0 : index
    %c0_10 = arith.constant 0 : index
    %11 = vector.load %arg6[%c0_9, %c0_10] : memref<1x32xf32, #tpu.memory_space<vmem>>, vector<1x32xf32>
    %12 = vector.broadcast %11 : vector<1x32xf32> to vector<8x32xf32>
    %13 = arith.addf %10, %12 : vector<8x32xf32>
    %cst_11 = arith.constant dense<0.000000e+00> : vector<8xf32>
    %14 = vector.multi_reduction <add>, %13, %cst_11 [1] : vector<8x32xf32> to vector<8xf32>
    %15 = vector.shape_cast %14 : vector<8xf32> to vector<8x1xf32>
    %cst_12 = arith.constant 3.200000e+01 : f32
    %16 = vector.broadcast %cst_12 : f32 to vector<8x1xf32>
    %17 = arith.divf %15, %16 : vector<8x1xf32>
    %18 = vector.broadcast %17 : vector<8x1xf32> to vector<8x32xf32>
    %19 = arith.subf %13, %18 : vector<8x32xf32>
    %20 = arith.mulf %19, %19 : vector<8x32xf32>
    %cst_13 = arith.constant dense<0.000000e+00> : vector<8xf32>
    %21 = vector.multi_reduction <add>, %20, %cst_13 [1] : vector<8x32xf32> to vector<8xf32>
    %22 = vector.shape_cast %21 : vector<8xf32> to vector<8x1xf32>
    %cst_14 = arith.constant 3.200000e+01 : f32
    %23 = vector.broadcast %cst_14 : f32 to vector<8x1xf32>
    %24 = arith.divf %22, %23 : vector<8x1xf32>
    %cst_15 = arith.constant 9.99999974E-6 : f32
    %25 = vector.broadcast %cst_15 : f32 to vector<8x1xf32>
    %26 = arith.addf %24, %25 : vector<8x1xf32>
    %27 = math.rsqrt %26 : vector<8x1xf32>
    %28 = vector.broadcast %27 : vector<8x1xf32> to vector<8x32xf32>
    %29 = arith.mulf %19, %28 : vector<8x32xf32>
    %c0_16 = arith.constant 0 : index
    %c0_17 = arith.constant 0 : index
    %30 = vector.load %arg7[%c0_16, %c0_17] : memref<1x32xf32, #tpu.memory_space<vmem>>, vector<1x32xf32>
    %31 = vector.broadcast %30 : vector<1x32xf32> to vector<8x32xf32>
    %32 = arith.mulf %29, %31 : vector<8x32xf32>
    %c0_18 = arith.constant 0 : index
    %c0_19 = arith.constant 0 : index
    %33 = vector.load %arg8[%c0_18, %c0_19] : memref<1x32xf32, #tpu.memory_space<vmem>>, vector<1x32xf32>
    %34 = vector.broadcast %33 : vector<1x32xf32> to vector<8x32xf32>
    %35 = arith.addf %32, %34 : vector<8x32xf32>
    %c0_20 = arith.constant 0 : index
    %c0_21 = arith.constant 0 : index
    %36 = vector.load %arg9[%c0_20, %c0_21] : memref<8x32xf32, #tpu.memory_space<vmem>>, vector<8x32xf32>
    tpu.vector_store %arg9[%c0_20, %c0_21], %35 {strides = array<i32>} : memref<8x32xf32, #tpu.memory_space<vmem>>, vector<8x32xf32>,
    return
  }
  func.func @transform_0(%arg0: i32, %arg1: i32) -> (i32, i32) {
    %c0_i32 = arith.constant 0 : i32
    %c0_i32_0 = arith.constant 0 : i32
    return %arg0, %c0_i32 : i32, i32
  }
  func.func @transform_1(%arg0: i32, %arg1: i32) -> (i32, i32) {
    %c0_i32 = arith.constant 0 : i32
    %c0_i32_0 = arith.constant 0 : i32
    return %c0_i32, %arg1 : i32, i32
  }
  func.func @transform_2(%arg0: i32, %arg1: i32) -> (i32, i32) {
    %c0_i32 = arith.constant 0 : i32
    %c0_i32_0 = arith.constant 0 : i32
    return %c0_i32, %arg1 : i32, i32
  }
  func.func @transform_3(%arg0: i32, %arg1: i32) -> (i32, i32) {
    %c0_i32 = arith.constant 0 : i32
    %c0_i32_0 = arith.constant 0 : i32
    return %arg1, %c0_i32 : i32, i32
  }
  func.func @transform_4(%arg0: i32, %arg1: i32) -> (i32, i32) {
    %c0_i32 = arith.constant 0 : i32
    %c0_i32_0 = arith.constant 0 : i32
    %c0_i32_1 = arith.constant 0 : i32
    return %c0_i32, %c0_i32_0 : i32, i32
  }
  func.func @transform_5(%arg0: i32, %arg1: i32) -> (i32, i32) {
    %c0_i32 = arith.constant 0 : i32
    %c0_i32_0 = arith.constant 0 : i32
    %c0_i32_1 = arith.constant 0 : i32
    return %c0_i32, %c0_i32_0 : i32, i32
  }
  func.func @transform_6(%arg0: i32, %arg1: i32) -> (i32, i32) {
    %c0_i32 = arith.constant 0 : i32
    %c0_i32_0 = arith.constant 0 : i32
    %c0_i32_1 = arith.constant 0 : i32
    return %c0_i32, %c0_i32_0 : i32, i32
  }
  func.func @transform_7(%arg0: i32, %arg1: i32) -> (i32, i32) {
    %c0_i32 = arith.constant 0 : i32
    %c0_i32_0 = arith.constant 0 : i32
    return %arg0, %c0_i32 : i32, i32
  }
}

module attributes {stable_mosaic.version = 11 : i64} {
  func.func @ffn_kernel(%arg0: i32, %arg1: i32, %arg2: memref<8x32xf32, #tpu.memory_space<vmem>>, %arg3: memref<32x64xf32, #tpu.memory_space<vmem>>, %arg4: memref<1x64xf32, #tpu.memory_space<vmem>>, %arg5: memref<64x32xf32, #tpu.memory_space<vmem>>, %arg6: memref<1x32xf32, #tpu.memory_space<vmem>>, %arg7: memref<1x32xf32, #tpu.memory_space<vmem>>, %arg8: memref<1x32xf32, #tpu.memory_space<vmem>>, %arg9: memref<8x32xf32, #tpu.memory_space<vmem>>, %arg10: memref<8x32xf32, #tpu.memory_space<vmem>>) attributes {dimension_semantics = [#tpu.dimension_semantics<parallel>, #tpu.dimension_semantics<arbitrary>], iteration_bounds = array<i64: 2, 1>, scalar_prefetch = 0 : i64, scratch_operands = 1 : i64, tpu.core_type = #tpu.core_type<tc>, window_params = [{transform_indices = @transform_0, window_bounds = array<i64: 8, 32>}, {transform_indices = @transform_1, window_bounds = array<i64: 32, 64>}, {transform_indices = @transform_2, window_bounds = array<i64: 1, 64>}, {transform_indices = @transform_3, window_bounds = array<i64: 64, 32>}, {pipeline_mode = #tpu.pipeline_mode<synchronous>, transform_indices = @transform_4, window_bounds = array<i64: 1, 32>}, {pipeline_mode = #tpu.pipeline_mode<synchronous>, transform_indices = @transform_5, window_bounds = array<i64: 1, 32>}, {pipeline_mode = #tpu.pipeline_mode<synchronous>, transform_indices = @transform_6, window_bounds = array<i64: 1, 32>}, {transform_indices = @transform_7, window_bounds = array<i64: 8, 32>}]} {
    %c0 = arith.constant 0 : index
    %c0_0 = arith.constant 0 : index
    %0 = vector.load %arg2[%c0, %c0_0] : memref<8x32xf32, #tpu.memory_space<vmem>>, vector<8x32xf32>
    %c0_1 = arith.constant 0 : index
    %c0_2 = arith.constant 0 : index
    %1 = vector.load %arg3[%c0_1, %c0_2] : memref<32x64xf32, #tpu.memory_space<vmem>>, vector<32x64xf32>
    %cst = arith.constant dense<0.000000e+00> : vector<8x64xf32>
    %2 = tpu.matmul %0, %1, %cst {dimension_numbers = #tpu.dot_dimension_numbers<[1], [0], [0], [1], [0, 0, 1, 1], [], []>} : vector<8x32xf32>, vector<32x64xf32>, vector<8x64xf32> -> vector<8x64xf32>
    %c0_3 = arith.constant 0 : index
    %c0_4 = arith.constant 0 : index
    %3 = vector.load %arg4[%c0_3, %c0_4] : memref<1x64xf32, #tpu.memory_space<vmem>>, vector<1x64xf32>
    %4 = vector.broadcast %3 : vector<1x64xf32> to vector<8x64xf32>
    %5 = arith.addf %2, %4 : vector<8x64xf32>
    %cst_5 = arith.constant 0.000000e+00 : f32
    %6 = vector.broadcast %cst_5 : f32 to vector<8x64xf32>
    %7 = arith.maximumf %5, %6 : vector<8x64xf32>
    %c0_6 = arith.constant 0 : index
    %c0_7 = arith.constant 0 : index
    %8 = vector.load %arg5[%c0_6, %c0_7] : memref<64x32xf32, #tpu.memory_space<vmem>>, vector<64x32xf32>
    %cst_8 = arith.constant dense<0.000000e+00> : vector<8x32xf32>
    %9 = tpu.matmul %7, %8, %cst_8 {dimension_numbers = #tpu.dot_dimension_numbers<[1], [0], [0], [1], [0, 0, 1, 1], [], []>} : vector<8x64xf32>, vector<64x32xf32>, vector<8x32xf32> -> vector<8x32xf32>
    %10 = arith.addf %0, %9 : vector<8x32xf32>
    %c0_9 = arith.constant 0 : index
    %c0_10 = arith.constant 0 : index
    %11 = vector.load %arg6[%c0_9, %c0_10] : memref<1x32xf32, #tpu.memory_space<vmem>>, vector<1x32xf32>
    %12 = vector.broadcast %11 : vector<1x32xf32> to vector<8x32xf32>
    %13 = arith.addf %10, %12 : vector<8x32xf32>
    %cst_11 = arith.constant dense<0.000000e+00> : vector<8xf32>
    %14 = vector.multi_reduction <add>, %13, %cst_11 [1] : vector<8x32xf32> to vector<8xf32>
    %15 = vector.shape_cast %14 : vector<8xf32> to vector<8x1xf32>
    %cst_12 = arith.constant 3.200000e+01 : f32
    %16 = vector.broadcast %cst_12 : f32 to vector<8x1xf32>
    %17 = arith.divf %15, %16 : vector<8x1xf32>
    %18 = vector.broadcast %17 : vector<8x1xf32> to vector<8x32xf32>
    %19 = arith.subf %13, %18 : vector<8x32xf32>
    %20 = arith.mulf %19, %19 : vector<8x32xf32>
    %cst_13 = arith.constant dense<0.000000e+00> : vector<8xf32>
    %21 = vector.multi_reduction <add>, %20, %cst_13 [1] : vector<8x32xf32> to vector<8xf32>
    %22 = vector.shape_cast %21 : vector<8xf32> to vector<8x1xf32>
    %cst_14 = arith.constant 3.200000e+01 : f32
    %23 = vector.broadcast %cst_14 : f32 to vector<8x1xf32>
    %24 = arith.divf %22, %23 : vector<8x1xf32>
    %cst_15 = arith.constant 9.99999974E-6 : f32
    %25 = vector.broadcast %cst_15 : f32 to vector<8x1xf32>
    %26 = arith.addf %24, %25 : vector<8x1xf32>
    %27 = math.rsqrt %26 : vector<8x1xf32>
    %28 = vector.broadcast %27 : vector<8x1xf32> to vector<8x32xf32>
    %29 = arith.mulf %19, %28 : vector<8x32xf32>
    %c0_16 = arith.constant 0 : index
    %c0_17 = arith.constant 0 : index
    %30 = vector.load %arg7[%c0_16, %c0_17] : memref<1x32xf32, #tpu.memory_space<vmem>>, vector<1x32xf32>
    %31 = vector.broadcast %30 : vector<1x32xf32> to vector<8x32xf32>
    %32 = arith.mulf %29, %31 : vector<8x32xf32>
    %c0_18 = arith.constant 0 : index
    %c0_19 = arith.constant 0 : index
    %33 = vector.load %arg8[%c0_18, %c0_19] : memref<1x32xf32, #tpu.memory_space<vmem>>, vector<1x32xf32>
    %34 = vector.broadcast %33 : vector<1x32xf32> to vector<8x32xf32>
    %35 = arith.addf %32, %34 : vector<8x32xf32>
    %c0_20 = arith.constant 0 : index
    %c0_21 = arith.constant 0 : index
    %36 = vector.load %arg9[%c0_20, %c0_21] : memref<8x32xf32, #tpu.memory_space<vmem>>, vector<8x32xf32>
    tpu.vector_store %arg9[%c0_20, %c0_21], %35 {strides = array<i32>} : memref<8x32xf32, #tpu.memory_space<vmem>>, vector<8x32xf32>,
    return
  }
  func.func @transform_0(%arg0: i32, %arg1: i32) -> (i32, i32) {
    %c0_i32 = arith.constant 0 : i32
    %c0_i32_0 = arith.constant 0 : i32
    return %arg0, %c0_i32 : i32, i32
  }
  func.func @transform_1(%arg0: i32, %arg1: i32) -> (i32, i32) {
    %c0_i32 = arith.constant 0 : i32
    %c0_i32_0 = arith.constant 0 : i32
    return %c0_i32, %arg1 : i32, i32
  }
  func.func @transform_2(%arg0: i32, %arg1: i32) -> (i32, i32) {
    %c0_i32 = arith.constant 0 : i32
    %c0_i32_0 = arith.constant 0 : i32
    return %c0_i32, %arg1 : i32, i32
  }
  func.func @transform_3(%arg0: i32, %arg1: i32) -> (i32, i32) {
    %c0_i32 = arith.constant 0 : i32
    %c0_i32_0 = arith.constant 0 : i32
    return %arg1, %c0_i32 : i32, i32
  }
  func.func @transform_4(%arg0: i32, %arg1: i32) -> (i32, i32) {
    %c0_i32 = arith.constant 0 : i32
    %c0_i32_0 = arith.constant 0 : i32
    %c0_i32_1 = arith.constant 0 : i32
    return %c0_i32, %c0_i32_0 : i32, i32
  }
  func.func @transform_5(%arg0: i32, %arg1: i32) -> (i32, i32) {
    %c0_i32 = arith.constant 0 : i32
    %c0_i32_0 = arith.constant 0 : i32
    %c0_i32_1 = arith.constant 0 : i32
    return %c0_i32, %c0_i32_0 : i32, i32
  }
  func.func @transform_6(%arg0: i32, %arg1: i32) -> (i32, i32) {
    %c0_i32 = arith.constant 0 : i32
    %c0_i32_0 = arith.constant 0 : i32
    %c0_i32_1 = arith.constant 0 : i32
    return %c0_i32, %c0_i32_0 : i32, i32
  }
  func.func @transform_7(%arg0: i32, %arg1: i32) -> (i32, i32) {
    %c0_i32 = arith.constant 0 : i32
    %c0_i32_0 = arith.constant 0 : i32
    return %arg0, %c0_i32 : i32, i32
  }
}

</mosaic_0001>

<bundles_post_ra>
// kernel: tpu_custom_call.1
= control target key start
LH: loop header
LB: loop body
LE: loop exit
PB: predicated region body
PF: predicated region fallthrough
CT: control target
= control target key end

     0   :  { %12 = vsyncpa [#allocation4], 0  ;;  %s1101_s0 = inlined_call_operand.vmem [shape: f32[16,32], index: 0, kind: input, shape index: {}]   ;;  %s1102_s1 = inlined_call_operand.vmem [shape: f32[32,64], index: 1, kind: input, shape index: {}]   ;;  %s1103_s2 = inlined_call_operand.vmem [shape: f32[1,64], index: 2, kind: input, shape index: {}]   ;;  %s1104_s3 = inlined_call_operand.vmem [shape: f32[64,32], index: 3, kind: input, shape index: {}]   ;;  %s1105_s4 = inlined_call_operand.vmem [shape: f32[1,32], index: 4, kind: input, shape index: {}]   ;;  %s1106_s5 = inlined_call_operand.vmem [shape: f32[1,32], index: 5, kind: input, shape index: {}]   ;;  %s1107_s6 = inlined_call_operand.vmem [shape: f32[1,32], index: 6, kind: input, shape index: {}]   ;;  %s1108_s7 = inlined_call_operand.hbm [shape: f32[16,32], index: 7, kind: output, shape index: {}]  }
   0x1   :  { %14 = vsyncpa [#allocation4 + $0x1], 0  ;;  %s937_s24 = smov 0   ;;  %s939_s25 = smov 0  }
   0x2   :  { %s941_s26 = smov 0   ;;  %s943_s27 = smov 0  }
   0x3   :  { %s945_s28 = smov 0   ;;  %s947_s29 = smov 0  }
   0x4 LB: > { %s671_s30 = sadd.s32 4294967295, %s891_s29   ;;  %s672_s8 = sadd.s32 4294967294, %s891_s29   ;;  %s891_s29 = sphi %s947_s29, %s20_s29   ;;  %s887_s28 = sphi %s945_s28, %s1115_s28   ;;  %s883_s27 = sphi %s943_s27, %s1114_s27   ;;  %s879_s26 = sphi %s941_s26, %s1113_s26   ;;  %s875_s25 = sphi %s939_s25, %s1112_s25   ;;  %s871_s24 = sphi %s937_s24, %s1111_s24  }
   0x5   : > { %s32_s9 = sadd.s32 1, %s887_s28  ;;  %s206_s10 = sadd.s32 1, %s879_s26 }
   0x6   : > { %p34_p0 = scmp.ge.s32.totalorder %s32_s9, 2  ;;  %p216_p1 = scmp.ne.s32.totalorder %s879_s26, %s875_s25 }
   0x7   : > { %p217_p2 = scmp.eq.s32.totalorder %s671_s30, 1  ;;  %p222_p3 = scmp.ne.s32.totalorder %s875_s25, %s871_s24 }
   0x8   : > { %s1117_s9 = smov (%p34_p0, %s32_s9), 0  ;;  %p223_p5 = scmp.eq.s32.totalorder %s672_s8, 1 }
   0x9   : > { %p977_p4 = por %p217_p2, %p216_p1  ;;  %s203_s12 = ssub.s32 %s887_s28, %s1117_s9 }
   0xa   : > { %p678_p6 = scmp.ge.s32.totalorder %s891_s29, 1  ;;  %p204_p7 = scmp.eq.s32.totalorder %s203_s12, 0 }
   0xb   : > { %p984_p8 = por %p223_p5, %p222_p3  ;;  %p279_p9 = scmp.lt.s32.totalorder %s891_s29, 3 }
   0xc   : > { %s990_s14 = scalar_select %p204_p7, %s879_s26, %s206_s10  }
   0xd   : > { %p280_p10 = pnand %p678_p6, %p279_p9 }
   0xe   : > { %v340_v0 = vld [vmem:[%s1102_s1] sm:$0xff] (!%p280_p10)  ;;  %v341_v1 = vld [vmem:[%s1102_s1 + $0x8] sm:$0xff] (!%p280_p10)  ;;  %v342_v2 = vld [vmem:[%s1102_s1 + $0x10] sm:$0xff] (!%p280_p10)  ;;  %v893_v3 = vmov (!%p280_p10), 0.0|0.0   ;;  %vm894_vm0 = vmmov (!%p280_p10), 0   ;;  %v895_v6 = vmov (!%p280_p10), 0.0  }
   0xf   : > { %283 = sbr.rel (%p280_p10) target bundleno = 786 (0x312), region = 48  ;;  %735 = vmatprep.subr.bf16.mxu0 (!%p280_p10), %v893_v3  ;;  %v736_v4 = vpack.c.bf16 (!%p280_p10), %v341_v1, %v340_v0  ;;  %v343_v5 = vld [vmem:[%s1102_s1 + $0x18] sm:$0xff] (!%p280_p10)  ;;  %713 = vmatprep.mubr.msk.f32.mxu0 (!%p280_p10), %vm894_vm0, %v895_v6  ;;  %p322_p11 = scmp.lt.s32.totalorder (!%p280_p10), %s883_s27, 1  ;;  %v426_v7 = vld [vmem:[%s1104_s3] sm:$0xff] (!%p280_p10)  ;;  %v427_v8 = vld [vmem:[%s1104_s3 + $0x8] sm:$0xff] (!%p280_p10)  ;;  %vm351_vm1 = vcmask (!%p280_p10), 261120  }
  0x10   : > { %741 = vmatprep.subr.bf16.mxu1 (!%p280_p10), %v893_v3  ;;  %v742_v9 = vpack.c.bf16 (!%p280_p10), %v427_v8, %v426_v7  ;;  %v428_v10 = vld [vmem:[%s1104_s3 + $0x10] sm:$0xff] (!%p280_p10)  ;;  %v429_v11 = vld [vmem:[%s1104_s3 + $0x18] sm:$0xff] (!%p280_p10)  ;;  %732 = vmatprep.mubr.msk.f32.mxu1 (!%p280_p10), %vm894_vm0, %v895_v6  ;;  %v739_v12 = vpack.c.bf16 (!%p280_p10), %v343_v5, %v342_v2  ;;  %v430_v14 = vld [vmem:[%s1104_s3 + $0x20] sm:$0xff] (!%p280_p10)  ;;  %vm434_vm2 = vcmask (!%p280_p10), 523264   ;;  %s319_s22 = sand.u32 (!%p280_p10), 1, %s875_s25   ;;  %s688_s15 = sshll.u32 (!%p280_p10), %s883_s27, 7 }
  0x11   : > { %737 = vmatpush3.bf16.msra.mxu0 (!%p280_p10), %v736_v4  ;;  %v745_v13 = vpack.c.bf16 (!%p280_p10), %v429_v11, %v428_v10  ;;  %v431_v15 = vld [vmem:[%s1104_s3 + $0x28] sm:$0xff] (!%p280_p10)  ;;  %v432_v18 = vld [vmem:[%s1104_s3 + $0x30] sm:$0xff] (!%p280_p10)  ;;  %v433_v19 = vld [vmem:[%s1104_s3 + $0x38] sm:$0xff] (!%p280_p10)  ;;  %s679_s23 = sshll.u32 (!%p280_p10), %s319_s22, 3  ;;  %s1053_s20 = scalar_lea.hbm (!%p280_p10), %s1108_s7, %s688_s15 }
  0x12   : > { %738 = vmatprep.subr.bf16.mxu0 (!%p280_p10), %v893_v3  ;;  %743 = vmatpush3.bf16.msra.mxu1 (!%p280_p10), %v742_v9  ;;  %v748_v17 = vpack.c.bf16 (!%p280_p10), %v431_v15, %v430_v14  ;;  %v751_v20 = vpack.c.bf16 (!%p280_p10), %v433_v19, %v432_v18  ;;  %v681_v21 = vld [vmem:[%s1103_s2] ss:$0 sm:$0xff] (!%p280_p10)  ;;  %s321_s16 = scalar_lea.vmem (!%p280_p10), [#allocation3], %s679_s23  ;;  %s549_s21 = scalar_lea.sflag (!%p280_p10), [#allocation4], %s319_s22 }
  0x13   : > { %744 = vmatprep.subr.bf16.mxu1 (!%p280_p10), %v893_v3  ;;  %v684_v27 = vld [vmem:[%s1105_s4] ss:$0 sm:$0xff] (!%p280_p10)  ;;  %s562_s17 = sshll.u32 (!%p280_p10), %s321_s16, 4  ;;  %s1055_s17 = int_to_ptr.vmem [resolvable:$true] %s562_s17 }
  0x14   : > { %v685_v41 = vld [vmem:[%s1106_s5] ss:$0 sm:$0xff] (!%p280_p10)  ;;  %s813_s30 = scalar_lea.vmem (!%p280_p10), %s1055_s17, 128 }
  0x15   : > { %740 = vmatpush3.bf16.msra.mxu0 (!%p280_p10), %v739_v12  ;;  %v686_v43 = vld [vmem:[%s1107_s6] ss:$0 sm:$0xff] (!%p280_p10)  ;;  %p814_p12 = scmp.ne.s32.totalorder (!%p280_p10), %s1055_s17, %s813_s30 }
  0x16   : > { %s323_s18 = scalar_select %p322_p11, %s883_s27, 1  ;;  %746 = vmatpush3.bf16.msra.mxu1 %v745_v13 }
  0x17   : > { %747 = vmatprep.subr.bf16.mxu1 %v893_v3  ;;  %p815_p13 = pnand %p814_p12, %p977_p4  ;;  %s896_s27 = smov [#allocation3]  }
  0x18   : > { %s680_s19 = sshll.u32 %s323_s18, 3  ;;  %s817_s23 = sshll.u32 %s896_s27, 4  ;;  %s818_s23 = int_to_ptr.vmem [resolvable:$false] %s817_s23 }
  0x19   : > { %s325_s10 = scalar_lea.vmem %s1101_s0, %s680_s19  ;;  %p816_p0 = pneg %p815_p13 }
  0x1a   : > { %v339_v16 = vld [vmem:[%s325_s10] sm:$0xff]  ;;  %749 = vmatpush3.bf16.msra.mxu1 %v748_v17  ;;  %s819_s8 = scalar_lea.vmem %s818_s23, 256  ;;  %p820_p1 = scmp.lt.s32.totalorder %s1055_s17, %s818_s23 }
  0x1b   : > { %714 = vmatmul.mubr.msk.f32.vlgmr.msra.gmra.mrb[0].mxu0 %vm351_vm1, %v339_v16  ;;  %750 = vmatprep.subr.bf16.mxu1 %v893_v3  ;;  %p821_p2 = scmp.lt.s32.totalorder %s819_s8, %s813_s30 }
  0x1d   : > { %p822_p3 = por %p821_p2, %p820_p1 }
  0x1e   : > { %752 = vmatpush3.bf16.msra.mxu1 %v751_v20 }
  0x1f   : > { %p823_p5 = pnand %p822_p3, %p816_p0 }
  0xee   : > { %v421_v22 = vpop.f32.mrb[0].mxu0 }
  0xef   : > { %v422_v23 = vadd.f32 %v681_v21, %v421_v22  ;;  %v715_v24 = vpop.f32.mrb[1].mxu0 }
  0xf1   : > { %v425_v25 = vmax.f32 %v422_v23, 0.0 }
  0xf3   : > { %733 = vmatmul.mubr.msk.f32.vlgmr.msra.gmra.mrb[0].mxu1 %vm434_vm2, %v425_v25 }
 0x1c6   : > { %v504_v26 = vpop.f32.mrb[0].mxu1 }
 0x1c7   : > { %v508_v28 = vadd.f32 %v504_v26, %v339_v16  ;;  %v734_v29 = vpop.f32.mrb[1].mxu1 }
 0x1c9   : > { %v516_v30 = vadd.f32 %v684_v27, %v508_v28 }
 0x1cb   : > { %v517_v31 = vsel %vm351_vm1, %v516_v30, 0.0 }
 0x1cc   : > { %518 = vadd.xlane.f32.xlu0 %v517_v31 }
 0x259   : > { %v519_v32 = vpop.xlane.xlu0 %518 }
 0x25a   : > { %v521_v33 = vmul.f32 0.03125, %v519_v32 }
 0x25c   : > { %v522_v34 = vsub.f32 %v516_v30, %v521_v33 }
 0x25e   : > { %v523_v35 = vmul.f32 %v522_v34, %v522_v34 }
 0x260   : > { %v524_v36 = vsel %vm351_vm1, %v523_v35, 0.0 }
 0x261   : > { %525 = vadd.xlane.f32.xlu0 %v524_v36 }
 0x2ee   : > { %v526_v37 = vpop.xlane.xlu0 %525 }
 0x2ef   : > { %v527_v38 = vmul.f32 0.03125, %v526_v37 }
 0x2f1   : > { %v528_v39 = vadd.f32 1e-05, %v527_v38 }
 0x2f3   : > { %811 = vrsqrt.f32 %v528_v39 }
 0x2fd   : > { %v812_v40 = vpop.eup %811 }
 0x2fe   : > { %v530_v42 = vmul.f32 %v812_v40, %v522_v34 }
 0x300   : > { %v538_v44 = vmul.f32 %v685_v41, %v530_v42 }
 0x302   : > { %v546_v45 = vadd.f32 %v686_v43, %v538_v44 }
 0x304   : > { %547 = vst.msk [vmem:[%s321_s16] sm:$0xff] %vm351_vm1, %v546_v45 }
 0x305   : > { %826 = shalt.err (!%p823_p5)
}
 0x306   : > { %s827_s22 = scalar_lea.hbm %s1053_s20, 128  ;;  %s831_s15 = scalar_lea.hbm %s1108_s7, 256 }
 0x307   : > { %p828_p6 = scmp.ne.s32.totalorder %s1053_s20, %s827_s22  ;;  %p832_p10 = scmp.lt.u32.totalorder %s1053_s20, %s1108_s7 }
 0x308   : > { %p833_p11 = scmp.lt.u32.totalorder %s831_s15, %s827_s22  ;;  %p835_p13 = scmp.lt.u32.totalorder %s827_s22, %s1053_s20 }
 0x309   : > { %p829_p7 = pnand %p828_p6, %p977_p4 }
 0x30a   : > { %p834_p12 = por %p833_p11, %p832_p10 }
 0x30b   : > { %p830_p9 = pneg %p829_p7 }
 0x30c   : > { %p836_p0 = por %p835_p13, %p834_p12 }
 0x30e   : > { %p837_p1 = pnand %p836_p0, %p830_p9 }
 0x310   : > { %840 = shalt.err (!%p837_p1)
}
 0x311   : > { %753 = dma.vmem_to_hbm [thread:$0]  (%p977_p4), %s1055_s17, 128, %s1053_s20, %s549_s21  }
 0x312 PF: > { %p759_p2 = scmp.ge.s32.totalorder %s891_s29, 2  ;;  %s574_s19 = sand.u32 1, %s871_s24  }
 0x313   : > { %s575_s30 = scalar_lea.sflag [#allocation4], %s574_s19 }
 0x314   : > { %p756_p3 = pnand %p759_p2, %p984_p8 }
 0x316   : > { %866 = dma.done.wait (!%p756_p3), %s575_s30, 128  }
 0x317   : > { %868 = vsyncadd (!%p756_p3), %s575_s30, 4294967168  ;;  %s20_s29 = sadd.s32 1, %s891_s29   ;;  %s1111_s24 = smov %s875_s25 }
 0x318   : > { %p17_p5 = scmp.ge.s32.totalorder %s20_s29, 4   ;;  %s1112_s25 = smov %s879_s26 }
 0x319   : > { %s1113_s26 = smov %s990_s14  ;;  %s1114_s27 = smov %s887_s28 }
 0x31a   : > { %s1115_s28 = smov %s1117_s9  ;;  %19 = sbr.rel (!%p17_p5) target bundleno = 4 (0x4), region = 92 }
 0x321   :  { %580 = vsyncpa [#allocation4], 1 }
 0x322   :  { %582 = vsyncpa [#allocation4 + $0x1], 1 }

// kernel: tpu_custom_call.1
= control target key start
LH: loop header
LB: loop body
LE: loop exit
PB: predicated region body
PF: predicated region fallthrough
CT: control target
= control target key end

     0   :  { %12 = vsyncpa [#allocation4], 0  ;;  %s1101_s0 = inlined_call_operand.vmem [shape: f32[16,32], index: 0, kind: input, shape index: {}]   ;;  %s1102_s1 = inlined_call_operand.vmem [shape: f32[32,64], index: 1, kind: input, shape index: {}]   ;;  %s1103_s2 = inlined_call_operand.vmem [shape: f32[1,64], index: 2, kind: input, shape index: {}]   ;;  %s1104_s3 = inlined_call_operand.vmem [shape: f32[64,32], index: 3, kind: input, shape index: {}]   ;;  %s1105_s4 = inlined_call_operand.vmem [shape: f32[1,32], index: 4, kind: input, shape index: {}]   ;;  %s1106_s5 = inlined_call_operand.vmem [shape: f32[1,32], index: 5, kind: input, shape index: {}]   ;;  %s1107_s6 = inlined_call_operand.vmem [shape: f32[1,32], index: 6, kind: input, shape index: {}]   ;;  %s1108_s7 = inlined_call_operand.hbm [shape: f32[16,32], index: 7, kind: output, shape index: {}]  }
   0x1   :  { %14 = vsyncpa [#allocation4 + $0x1], 0  ;;  %s937_s24 = smov 0   ;;  %s939_s25 = smov 0  }
   0x2   :  { %s941_s26 = smov 0   ;;  %s943_s27 = smov 0  }
   0x3   :  { %s945_s28 = smov 0   ;;  %s947_s29 = smov 0  }
   0x4 LB: > { %s671_s30 = sadd.s32 4294967295, %s891_s29   ;;  %s672_s8 = sadd.s32 4294967294, %s891_s29   ;;  %s891_s29 = sphi %s947_s29, %s20_s29   ;;  %s887_s28 = sphi %s945_s28, %s1115_s28   ;;  %s883_s27 = sphi %s943_s27, %s1114_s27   ;;  %s879_s26 = sphi %s941_s26, %s1113_s26   ;;  %s875_s25 = sphi %s939_s25, %s1112_s25   ;;  %s871_s24 = sphi %s937_s24, %s1111_s24  }
   0x5   : > { %s32_s9 = sadd.s32 1, %s887_s28  ;;  %s206_s10 = sadd.s32 1, %s879_s26 }
   0x6   : > { %p34_p0 = scmp.ge.s32.totalorder %s32_s9, 2  ;;  %p216_p1 = scmp.ne.s32.totalorder %s879_s26, %s875_s25 }
   0x7   : > { %p217_p2 = scmp.eq.s32.totalorder %s671_s30, 1  ;;  %p222_p3 = scmp.ne.s32.totalorder %s875_s25, %s871_s24 }
   0x8   : > { %s1117_s9 = smov (%p34_p0, %s32_s9), 0  ;;  %p223_p5 = scmp.eq.s32.totalorder %s672_s8, 1 }
   0x9   : > { %p977_p4 = por %p217_p2, %p216_p1  ;;  %s203_s12 = ssub.s32 %s887_s28, %s1117_s9 }
   0xa   : > { %p678_p6 = scmp.ge.s32.totalorder %s891_s29, 1  ;;  %p204_p7 = scmp.eq.s32.totalorder %s203_s12, 0 }
   0xb   : > { %p984_p8 = por %p223_p5, %p222_p3  ;;  %p279_p9 = scmp.lt.s32.totalorder %s891_s29, 3 }
   0xc   : > { %s990_s14 = scalar_select %p204_p7, %s879_s26, %s206_s10  }
   0xd   : > { %p280_p10 = pnand %p678_p6, %p279_p9 }
   0xe   : > { %v340_v0 = vld [vmem:[%s1102_s1] sm:$0xff] (!%p280_p10)  ;;  %v341_v1 = vld [vmem:[%s1102_s1 + $0x8] sm:$0xff] (!%p280_p10)  ;;  %v342_v2 = vld [vmem:[%s1102_s1 + $0x10] sm:$0xff] (!%p280_p10)  ;;  %v893_v3 = vmov (!%p280_p10), 0.0|0.0   ;;  %vm894_vm0 = vmmov (!%p280_p10), 0   ;;  %v895_v6 = vmov (!%p280_p10), 0.0  }
   0xf   : > { %283 = sbr.rel (%p280_p10) target bundleno = 786 (0x312), region = 48  ;;  %735 = vmatprep.subr.bf16.mxu0 (!%p280_p10), %v893_v3  ;;  %v736_v4 = vpack.c.bf16 (!%p280_p10), %v341_v1, %v340_v0  ;;  %v343_v5 = vld [vmem:[%s1102_s1 + $0x18] sm:$0xff] (!%p280_p10)  ;;  %713 = vmatprep.mubr.msk.f32.mxu0 (!%p280_p10), %vm894_vm0, %v895_v6  ;;  %p322_p11 = scmp.lt.s32.totalorder (!%p280_p10), %s883_s27, 1  ;;  %v426_v7 = vld [vmem:[%s1104_s3] sm:$0xff] (!%p280_p10)  ;;  %v427_v8 = vld [vmem:[%s1104_s3 + $0x8] sm:$0xff] (!%p280_p10)  ;;  %vm351_vm1 = vcmask (!%p280_p10), 261120  }
  0x10   : > { %741 = vmatprep.subr.bf16.mxu1 (!%p280_p10), %v893_v3  ;;  %v742_v9 = vpack.c.bf16 (!%p280_p10), %v427_v8, %v426_v7  ;;  %v428_v10 = vld [vmem:[%s1104_s3 + $0x10] sm:$0xff] (!%p280_p10)  ;;  %v429_v11 = vld [vmem:[%s1104_s3 + $0x18] sm:$0xff] (!%p280_p10)  ;;  %732 = vmatprep.mubr.msk.f32.mxu1 (!%p280_p10), %vm894_vm0, %v895_v6  ;;  %v739_v12 = vpack.c.bf16 (!%p280_p10), %v343_v5, %v342_v2  ;;  %v430_v14 = vld [vmem:[%s1104_s3 + $0x20] sm:$0xff] (!%p280_p10)  ;;  %vm434_vm2 = vcmask (!%p280_p10), 523264   ;;  %s319_s22 = sand.u32 (!%p280_p10), 1, %s875_s25   ;;  %s688_s15 = sshll.u32 (!%p280_p10), %s883_s27, 7 }
  0x11   : > { %737 = vmatpush3.bf16.msra.mxu0 (!%p280_p10), %v736_v4  ;;  %v745_v13 = vpack.c.bf16 (!%p280_p10), %v429_v11, %v428_v10  ;;  %v431_v15 = vld [vmem:[%s1104_s3 + $0x28] sm:$0xff] (!%p280_p10)  ;;  %v432_v18 = vld [vmem:[%s1104_s3 + $0x30] sm:$0xff] (!%p280_p10)  ;;  %v433_v19 = vld [vmem:[%s1104_s3 + $0x38] sm:$0xff] (!%p280_p10)  ;;  %s679_s23 = sshll.u32 (!%p280_p10), %s319_s22, 3  ;;  %s1053_s20 = scalar_lea.hbm (!%p280_p10), %s1108_s7, %s688_s15 }
  0x12   : > { %738 = vmatprep.subr.bf16.mxu0 (!%p280_p10), %v893_v3  ;;  %743 = vmatpush3.bf16.msra.mxu1 (!%p280_p10), %v742_v9  ;;  %v748_v17 = vpack.c.bf16 (!%p280_p10), %v431_v15, %v430_v14  ;;  %v751_v20 = vpack.c.bf16 (!%p280_p10), %v433_v19, %v432_v18  ;;  %v681_v21 = vld [vmem:[%s1103_s2] ss:$0 sm:$0xff] (!%p280_p10)  ;;  %s321_s16 = scalar_lea.vmem (!%p280_p10), [#allocation3], %s679_s23  ;;  %s549_s21 = scalar_lea.sflag (!%p280_p10), [#allocation4], %s319_s22 }
  0x13   : > { %744 = vmatprep.subr.bf16.mxu1 (!%p280_p10), %v893_v3  ;;  %v684_v27 = vld [vmem:[%s1105_s4] ss:$0 sm:$0xff] (!%p280_p10)  ;;  %s562_s17 = sshll.u32 (!%p280_p10), %s321_s16, 4  ;;  %s1055_s17 = int_to_ptr.vmem [resolvable:$true] %s562_s17 }
  0x14   : > { %v685_v41 = vld [vmem:[%s1106_s5] ss:$0 sm:$0xff] (!%p280_p10)  ;;  %s813_s30 = scalar_lea.vmem (!%p280_p10), %s1055_s17, 128 }
  0x15   : > { %740 = vmatpush3.bf16.msra.mxu0 (!%p280_p10), %v739_v12  ;;  %v686_v43 = vld [vmem:[%s1107_s6] ss:$0 sm:$0xff] (!%p280_p10)  ;;  %p814_p12 = scmp.ne.s32.totalorder (!%p280_p10), %s1055_s17, %s813_s30 }
  0x16   : > { %s323_s18 = scalar_select %p322_p11, %s883_s27, 1  ;;  %746 = vmatpush3.bf16.msra.mxu1 %v745_v13 }
  0x17   : > { %747 = vmatprep.subr.bf16.mxu1 %v893_v3  ;;  %p815_p13 = pnand %p814_p12, %p977_p4  ;;  %s896_s27 = smov [#allocation3]  }
  0x18   : > { %s680_s19 = sshll.u32 %s323_s18, 3  ;;  %s817_s23 = sshll.u32 %s896_s27, 4  ;;  %s818_s23 = int_to_ptr.vmem [resolvable:$false] %s817_s23 }
  0x19   : > { %s325_s10 = scalar_lea.vmem %s1101_s0, %s680_s19  ;;  %p816_p0 = pneg %p815_p13 }
  0x1a   : > { %v339_v16 = vld [vmem:[%s325_s10] sm:$0xff]  ;;  %749 = vmatpush3.bf16.msra.mxu1 %v748_v17  ;;  %s819_s8 = scalar_lea.vmem %s818_s23, 256  ;;  %p820_p1 = scmp.lt.s32.totalorder %s1055_s17, %s818_s23 }
  0x1b   : > { %714 = vmatmul.mubr.msk.f32.vlgmr.msra.gmra.mrb[0].mxu0 %vm351_vm1, %v339_v16  ;;  %750 = vmatprep.subr.bf16.mxu1 %v893_v3  ;;  %p821_p2 = scmp.lt.s32.totalorder %s819_s8, %s813_s30 }
  0x1d   : > { %p822_p3 = por %p821_p2, %p820_p1 }
  0x1e   : > { %752 = vmatpush3.bf16.msra.mxu1 %v751_v20 }
  0x1f   : > { %p823_p5 = pnand %p822_p3, %p816_p0 }
  0xee   : > { %v421_v22 = vpop.f32.mrb[0].mxu0 }
  0xef   : > { %v422_v23 = vadd.f32 %v681_v21, %v421_v22  ;;  %v715_v24 = vpop.f32.mrb[1].mxu0 }
  0xf1   : > { %v425_v25 = vmax.f32 %v422_v23, 0.0 }
  0xf3   : > { %733 = vmatmul.mubr.msk.f32.vlgmr.msra.gmra.mrb[0].mxu1 %vm434_vm2, %v425_v25 }
 0x1c6   : > { %v504_v26 = vpop.f32.mrb[0].mxu1 }
 0x1c7   : > { %v508_v28 = vadd.f32 %v504_v26, %v339_v16  ;;  %v734_v29 = vpop.f32.mrb[1].mxu1 }
 0x1c9   : > { %v516_v30 = vadd.f32 %v684_v27, %v508_v28 }
 0x1cb   : > { %v517_v31 = vsel %vm351_vm1, %v516_v30, 0.0 }
 0x1cc   : > { %518 = vadd.xlane.f32.xlu0 %v517_v31 }
 0x259   : > { %v519_v32 = vpop.xlane.xlu0 %518 }
 0x25a   : > { %v521_v33 = vmul.f32 0.03125, %v519_v32 }
 0x25c   : > { %v522_v34 = vsub.f32 %v516_v30, %v521_v33 }
 0x25e   : > { %v523_v35 = vmul.f32 %v522_v34, %v522_v34 }
 0x260   : > { %v524_v36 = vsel %vm351_vm1, %v523_v35, 0.0 }
 0x261   : > { %525 = vadd.xlane.f32.xlu0 %v524_v36 }
 0x2ee   : > { %v526_v37 = vpop.xlane.xlu0 %525 }
 0x2ef   : > { %v527_v38 = vmul.f32 0.03125, %v526_v37 }
 0x2f1   : > { %v528_v39 = vadd.f32 1e-05, %v527_v38 }
 0x2f3   : > { %811 = vrsqrt.f32 %v528_v39 }
 0x2fd   : > { %v812_v40 = vpop.eup %811 }
 0x2fe   : > { %v530_v42 = vmul.f32 %v812_v40, %v522_v34 }
 0x300   : > { %v538_v44 = vmul.f32 %v685_v41, %v530_v42 }
 0x302   : > { %v546_v45 = vadd.f32 %v686_v43, %v538_v44 }
 0x304   : > { %547 = vst.msk [vmem:[%s321_s16] sm:$0xff] %vm351_vm1, %v546_v45 }
 0x305   : > { %826 = shalt.err (!%p823_p5)
}
 0x306   : > { %s827_s22 = scalar_lea.hbm %s1053_s20, 128  ;;  %s831_s15 = scalar_lea.hbm %s1108_s7, 256 }
 0x307   : > { %p828_p6 = scmp.ne.s32.totalorder %s1053_s20, %s827_s22  ;;  %p832_p10 = scmp.lt.u32.totalorder %s1053_s20, %s1108_s7 }
 0x308   : > { %p833_p11 = scmp.lt.u32.totalorder %s831_s15, %s827_s22  ;;  %p835_p13 = scmp.lt.u32.totalorder %s827_s22, %s1053_s20 }
 0x309   : > { %p829_p7 = pnand %p828_p6, %p977_p4 }
 0x30a   : > { %p834_p12 = por %p833_p11, %p832_p10 }
 0x30b   : > { %p830_p9 = pneg %p829_p7 }
 0x30c   : > { %p836_p0 = por %p835_p13, %p834_p12 }
 0x30e   : > { %p837_p1 = pnand %p836_p0, %p830_p9 }
 0x310   : > { %840 = shalt.err (!%p837_p1)
}
 0x311   : > { %753 = dma.vmem_to_hbm [thread:$0]  (%p977_p4), %s1055_s17, 128, %s1053_s20, %s549_s21  }
 0x312 PF: > { %p759_p2 = scmp.ge.s32.totalorder %s891_s29, 2  ;;  %s574_s19 = sand.u32 1, %s871_s24  }
 0x313   : > { %s575_s30 = scalar_lea.sflag [#allocation4], %s574_s19 }
 0x314   : > { %p756_p3 = pnand %p759_p2, %p984_p8 }
 0x316   : > { %866 = dma.done.wait (!%p756_p3), %s575_s30, 128  }
 0x317   : > { %868 = vsyncadd (!%p756_p3), %s575_s30, 4294967168  ;;  %s20_s29 = sadd.s32 1, %s891_s29   ;;  %s1111_s24 = smov %s875_s25 }
 0x318   : > { %p17_p5 = scmp.ge.s32.totalorder %s20_s29, 4   ;;  %s1112_s25 = smov %s879_s26 }
 0x319   : > { %s1113_s26 = smov %s990_s14  ;;  %s1114_s27 = smov %s887_s28 }
 0x31a   : > { %s1115_s28 = smov %s1117_s9  ;;  %19 = sbr.rel (!%p17_p5) target bundleno = 4 (0x4), region = 92 }
 0x321   :  { %580 = vsyncpa [#allocation4], 1 }
 0x322   :  { %582 = vsyncpa [#allocation4 + $0x1], 1 }

</bundles_post_ra>
